<compile_context>
chip_gen: v7x
topology: tpu7x:2x2x1
jax: 0.10.0
libtpu: 0.0.40
codegen_flags: <defaults>
</compile_context>

<pallas_src>
import math

import jax
import jax.numpy as jnp
from jax.experimental import pallas as pl
from jax.experimental.pallas import tpu as pltpu


def _copy_kernel(x_ref, o_ref):
    # Identity move through VMEM — the reshape itself is realized by the
    # wrapper's metadata-only reshapes (matches torch .view ordering).
    o_ref[...] = x_ref[...]


def _pick_lane_width(total):
    """Largest multiple-of-128 divisor of `total` (capped at 2048), preferring
    one that leaves >= 8 rows so blocks fill full (8, 128) vregs."""
    best = None
    for cand in (2048, 1024, 512, 256, 128):
        if total % cand == 0:
            if best is None:
                best = cand
            if total // cand >= 8:
                return cand
    return best  # None if total % 128 != 0


def _pick_block_rows(rows, row_bytes, target_bytes=2 * 1024 * 1024):
    """Largest multiple-of-8 divisor of `rows` whose block stays <= ~2 MiB.
    Falls back to the full extent (always legal) if no such divisor exists."""
    if rows <= 8:
        return rows
    max_rows = max(8, target_bytes // row_bytes)
    if rows <= max_rows:
        return rows
    cand = (max_rows // 8) * 8
    while cand >= 8:
        if rows % cand == 0:
            return cand
        cand -= 8
    return rows  # full-extent fallback (small/odd row counts only)


def _materialized_copy(x2d):
    """Pallas identity copy of a 2-D, lane-dense view through VMEM."""
    rows, cols = x2d.shape
    itemsize = jnp.dtype(x2d.dtype).itemsize
    block_rows = _pick_block_rows(rows, cols * itemsize)
    grid = (rows // block_rows,)

    return pl.pallas_call(
        _copy_kernel,
        out_shape=jax.ShapeDtypeStruct((rows, cols), x2d.dtype),
        grid_spec=pltpu.PrefetchScalarGridSpec(
            num_scalar_prefetch=0,
            grid=grid,
            in_specs=[pl.BlockSpec((block_rows, cols), lambda i: (i, 0))],
            out_specs=pl.BlockSpec((block_rows, cols), lambda i: (i, 0)),
        ),
        compiler_params=pltpu.CompilerParams(
            dimension_semantics=("parallel",),
        ),
        cost_estimate=pl.CostEstimate(
            flops=0,
            transcendentals=0,
            bytes_accessed=2 * rows * cols * itemsize,
        ),
    )(x2d)


def pallas_reshape(x, shape, materialize=False):
    """Equivalent of Reshape(*shape)(x) == x.view(*shape, -1).

    materialize=False (default, recommended): metadata-only reshape, 0 bytes.
    materialize=True: force the elements through a Pallas VMEM copy kernel
    with a lane-dense, VMEM-capped tiling (for benchmarks that require a
    materialized output).
    """
    lead = int(math.prod(shape)) if len(shape) > 0 else 1
    total = int(math.prod(x.shape))
    assert total % lead == 0, "leading dims must divide total element count"
    trail = total // lead
    out_shape = tuple(shape) + (trail,)

    if not materialize:
        # Fast path: a contiguous row-major view is free.
        return jnp.reshape(x, out_shape)

    # --- materialized copy path -------------------------------------------
    # Choose a lane-dense 2-D factorization of `total`, independent of
    # (lead, trail); both reshapes below are metadata-only and preserve
    # row-major ordering, so the result is bit-identical to x.view(*shape,-1).
    cols = _pick_lane_width(total)
    if cols is None:
        # total not a multiple of 128: single full-extent block (legal because
        # block dims equal the array dims). Degraded but correct; rare case.
        x2d = jnp.reshape(x, (1, total))
    else:
        x2d = jnp.reshape(x, (total // cols, cols))

    out2d = _materialized_copy(x2d)
    return jnp.reshape(out2d, out_shape)


if __name__ == "__main__":
    key = jax.random.PRNGKey(0)
    # NCHW input consistent with a conv-net flatten use-case.
    x = jax.random.normal(key, (2, 4, 16, 16), dtype=jnp.float32)

    # Module instantiated as Reshape(2): output = x.view(2, -1) -> (2, 1024)
    shape_args = (2,)
    ref = jnp.reshape(x, (2, -1))

    # Fast (metadata-only) path — the recommended production path.
    out_meta = jax.block_until_ready(pallas_reshape(x, shape_args))
    assert out_meta.shape == (2, 1024) and out_meta.dtype == x.dtype
    assert bool(jnp.all(out_meta == ref))

    # Materialized path — exercises the Pallas copy kernel on TPU.
    out_mat = jax.block_until_ready(
        pallas_reshape(x, shape_args, materialize=True)
    )
    assert out_mat.shape == (2, 1024) and out_mat.dtype == x.dtype
    assert bool(jnp.all(out_mat == ref))

    print("KERNEL_OK")
</pallas_src>

<mosaic_0001>
module attributes {stable_mosaic.version = 11 : i64} {
  func.func @_copy_kernel(%arg0: i32, %arg1: memref<8x256xf32, #tpu.memory_space<vmem>>, %arg2: memref<8x256xf32, #tpu.memory_space<vmem>>) attributes {dimension_semantics = [#tpu.dimension_semantics<parallel>], iteration_bounds = array<i64: 1>, scalar_prefetch = 0 : i64, scratch_operands = 0 : i64, tpu.core_type = #tpu.core_type<tc>, window_params = [{transform_indices = @transform_0, window_bounds = array<i64: 8, 256>}, {transform_indices = @transform_1, window_bounds = array<i64: 8, 256>}]} {
    %c0 = arith.constant 0 : index
    %c0_0 = arith.constant 0 : index
    %0 = vector.load %arg1[%c0, %c0_0] : memref<8x256xf32, #tpu.memory_space<vmem>>, vector<8x256xf32>
    %c0_1 = arith.constant 0 : index
    %c0_2 = arith.constant 0 : index
    %1 = vector.load %arg2[%c0_1, %c0_2] : memref<8x256xf32, #tpu.memory_space<vmem>>, vector<8x256xf32>
    tpu.vector_store %arg2[%c0_1, %c0_2], %0 {strides = array<i32>} : memref<8x256xf32, #tpu.memory_space<vmem>>, vector<8x256xf32>,
    return
  }
  func.func @transform_0(%arg0: i32) -> (i32, i32) {
    %c0_i32 = arith.constant 0 : i32
    %c0_i32_0 = arith.constant 0 : i32
    return %arg0, %c0_i32 : i32, i32
  }
  func.func @transform_1(%arg0: i32) -> (i32, i32) {
    %c0_i32 = arith.constant 0 : i32
    %c0_i32_0 = arith.constant 0 : i32
    return %arg0, %c0_i32 : i32, i32
  }
}

</mosaic_0001>

<bundles_post_ra>
// kernel: tpu_custom_call.1
= control target key start
LH: loop header
LB: loop body
LE: loop exit
PB: predicated region body
PF: predicated region fallthrough
CT: control target
= control target key end

     0   :  { %6 = vsyncpa [#allocation3], 0  ;;  %s126_s0 = inlined_call_operand.hbm [shape: f32[8,256], index: 0, kind: input, shape index: {}]   ;;  %s127_s1 = inlined_call_operand.hbm [shape: f32[8,256], index: 1, kind: output, shape index: {}]  }
   0x1   :  { %7 = vsyncpa [#allocation4], 0  ;;  %s90_s6 = smov [#allocation2]   ;;  %s42_s10 = scalar_lea.hbm %s126_s0, 256 }
   0x2   :  { %s14_s7 = sshll.u32 %s90_s6, 4  ;;  %p43_p0 = scmp.ne.s32.totalorder %s126_s0, %s42_s10  ;;  %s15_s7 = int_to_ptr.vmem [resolvable:$true] %s14_s7 }
   0x3   :  { %p46_p1 = scmp.lt.u32.totalorder %s42_s10, %s126_s0 }
   0x5   :  { %p48_p2 = pnand %p46_p1, %p43_p0 }
   0x7   :  { %51 = shalt.err (!%p48_p2)
}
   0x8   :  { %s52_s15 = scalar_lea.vmem %s15_s7, 256  ;;  %p57_p4 = scmp.lt.s32.totalorder %s15_s7, %s15_s7 }
   0x9   :  { %p53_p3 = scmp.ne.s32.totalorder %s15_s7, %s52_s15  ;;  %p58_p5 = scmp.lt.s32.totalorder %s52_s15, %s52_s15 }
   0xb   :  { %p59_p6 = por %p58_p5, %p57_p4 }
   0xd   :  { %p60_p7 = pnand %p59_p6, %p53_p3 }
   0xf   :  { %63 = shalt.err (!%p60_p7)
}
  0x10   :  { %17 = dma.hbm_to_vmem [thread:$0]  %s126_s0, 256, %s15_s7, [#allocation3]  }
  0x11   :  { %86 = dma.done.wait [#allocation3], 256  }
  0x12   :  { %87 = vsyncadd [#allocation3], 4294967040  ;;  %s91_s18 = smov [#allocation5]   ;;  %v21_v0 = vld [vmem:[#allocation2] sm:$0xff]  ;;  %v22_v1 = vld [vmem:[#allocation2 + $0x8] sm:$0xff] }
  0x13   :  { %s31_s19 = sshll.u32 %s91_s18, 4  ;;  %23 = vst [vmem:[#allocation5] sm:$0xff] %v21_v0  ;;  %24 = vst [vmem:[#allocation5 + $0x8] sm:$0xff] %v22_v1  ;;  %s32_s19 = int_to_ptr.vmem [resolvable:$true] %s31_s19 }
  0x14   :  { %s64_s20 = scalar_lea.vmem %s32_s19, 256  ;;  %p69_p9 = scmp.lt.s32.totalorder %s32_s19, %s32_s19 }
  0x15   :  { %p65_p8 = scmp.ne.s32.totalorder %s32_s19, %s64_s20  ;;  %p70_p10 = scmp.lt.s32.totalorder %s64_s20, %s64_s20 }
  0x17   :  { %p71_p11 = por %p70_p10, %p69_p9 }
  0x19   :  { %p72_p12 = pnand %p71_p11, %p65_p8 }
  0x1b   :  { %75 = shalt.err (!%p72_p12)
}
  0x1c   :  { %s76_s0 = scalar_lea.hbm %s127_s1, 256 }
  0x1d   :  { %p77_p13 = scmp.ne.s32.totalorder %s127_s1, %s76_s0  ;;  %p80_p0 = scmp.lt.u32.totalorder %s76_s0, %s127_s1 }
  0x1f   :  { %p82_p1 = pnand %p80_p0, %p77_p13 }
  0x21   :  { %85 = shalt.err (!%p82_p1)
}
  0x22   :  { %34 = dma.vmem_to_hbm [thread:$0]  %s32_s19, 256, %s127_s1, [#allocation4]  }
  0x23   :  { %88 = dma.done.wait [#allocation4], 256  }
  0x24   :  { %89 = vsyncadd [#allocation4], 4294967040 }
  0x25   :  { %38 = vsyncpa [#allocation3], 1 }
  0x26   :  { %39 = vsyncpa [#allocation4], 1 }

</bundles_post_ra>
